<compile_context>
chip_gen: v7x
topology: tpu7x:2x2x1
jax: 0.10.0
libtpu: 0.0.40
codegen_flags: <defaults>
</compile_context>

<pallas_src>
import jax
import jax.numpy as jnp
from jax.experimental import pallas as pl
from jax.experimental.pallas import tpu as pltpu  # noqa: F401  (TPU backend)


def _module3_kernel(a_h_ref, a_m_ref, a_s_ref,
                    b_h_ref, b_m_ref, b_s_ref,
                    w_ref, bias_ref,
                    a_out_ref, b_out_ref):
    # a_*_ref / b_*_ref : [B, E]   in VMEM
    # w_ref             : [6E, 2E] in VMEM (block-diag: wa top-left, wb bottom-right)
    # bias_ref          : [1, 2E]  in VMEM (ba || bb)
    # a_out_ref/b_out_ref : [B, E]
    E = a_h_ref.shape[-1]

    # Fuse the feature-axis concats in-kernel: one [B, 6E] lane concat.
    x = jnp.concatenate(
        [a_h_ref[...], a_m_ref[...], a_s_ref[...],
         b_h_ref[...], b_m_ref[...], b_s_ref[...]], axis=-1)

    # Single MXU push/pop against the init-time block-diagonal weight.
    fused = jnp.dot(x, w_ref[...], preferred_element_type=jnp.float32)
    fused = fused + bias_ref[...]

    # Two direct stores -> no wrapper-side slicing needed.
    a_out_ref[...] = fused[:, :E].astype(a_out_ref.dtype)
    b_out_ref[...] = fused[:, E:].astype(b_out_ref.dtype)


def pack_module3_params(wa, ba, wb, bb):
    """ONE-TIME (init-time) parameter packing. Do NOT call per forward step.

    wa, wb: [3E, E]  (already transposed vs PyTorch's nn.Linear [E, 3E] layout)
    ba, bb: [E]
    Returns (w_fused [6E, 2E] block-diagonal, bias_fused [1, 2E]).
    """
    K, E = wa.shape  # K = 3E
    w_fused = jnp.zeros((2 * K, 2 * E), dtype=wa.dtype)
    w_fused = w_fused.at[:K, :E].set(wa)
    w_fused = w_fused.at[K:, E:].set(wb)
    bias_fused = jnp.concatenate([ba, bb]).reshape(1, 2 * E)
    return w_fused, bias_fused


def module_3_forward(a_hour, a_minute, a_second,
                     b_hour, b_minute, b_second,
                     w_fused, bias_fused):
    """Pallas implementation of Module_3.forward (eval mode).

    Returns (b_embedding, a_embedding), each [B, E] — same order as PyTorch.
    """
    B, E = a_hour.shape
    K2, N2 = w_fused.shape          # 6E, 2E
    out_dtype = a_hour.dtype
    bytes_per = jnp.dtype(out_dtype).itemsize

    # Single grid point, full-array blocks resident in VMEM (< 60 KiB total).
    full = lambda shape: pl.BlockSpec(shape, lambda: (0,) * len(shape))

    cost = pl.CostEstimate(
        flops=2 * B * K2 * N2,
        transcendentals=0,
        bytes_accessed=(6 * B * E + K2 * N2 + N2 + 2 * B * E) * bytes_per,
    )

    a_emb, b_emb = pl.pallas_call(
        _module3_kernel,
        out_shape=(jax.ShapeDtypeStruct((B, E), out_dtype),
                   jax.ShapeDtypeStruct((B, E), out_dtype)),
        grid=(),
        in_specs=[full((B, E)), full((B, E)), full((B, E)),
                  full((B, E)), full((B, E)), full((B, E)),
                  full((K2, N2)), full((1, N2))],
        out_specs=(full((B, E)), full((B, E))),
        cost_estimate=cost,
    )(a_hour, a_minute, a_second, b_hour, b_minute, b_second,
      w_fused, bias_fused)

    return b_emb, a_emb  # PyTorch return order


def init_linear_params(key, in_features, out_features, dtype=jnp.float32):
    # Deterministic init mirroring nn.Linear's uniform(-1/sqrt(in), 1/sqrt(in)).
    k_w, k_b = jax.random.split(key)
    bound = 1.0 / jnp.sqrt(jnp.float32(in_features))
    # Stored directly in [in, out] layout (already transposed vs PyTorch).
    w = jax.random.uniform(k_w, (in_features, out_features), dtype,
                           minval=-bound, maxval=bound)
    b = jax.random.uniform(k_b, (out_features,), dtype,
                           minval=-bound, maxval=bound)
    return w, b


if __name__ == "__main__":
    embedding_dim = 32
    batch = 8

    key = jax.random.PRNGKey(0)
    keys = jax.random.split(key, 8)

    # Parameters for a_linear and b_linear (3E -> E), packed ONCE.
    wa, ba = init_linear_params(keys[0], embedding_dim * 3, embedding_dim)
    wb, bb = init_linear_params(keys[1], embedding_dim * 3, embedding_dim)
    w_fused, bias_fused = pack_module3_params(wa, ba, wb, bb)
    w_fused, bias_fused = jax.block_until_ready((w_fused, bias_fused))

    # Inputs: six time-component embeddings, each [B, E].
    a_hour   = jax.random.normal(keys[2], (batch, embedding_dim), jnp.float32)
    a_minute = jax.random.normal(keys[3], (batch, embedding_dim), jnp.float32)
    a_second = jax.random.normal(keys[4], (batch, embedding_dim), jnp.float32)
    b_hour   = jax.random.normal(keys[5], (batch, embedding_dim), jnp.float32)
    b_minute = jax.random.normal(keys[6], (batch, embedding_dim), jnp.float32)
    b_second = jax.random.normal(keys[7], (batch, embedding_dim), jnp.float32)

    b_emb, a_emb = module_3_forward(a_hour, a_minute, a_second,
                                    b_hour, b_minute, b_second,
                                    w_fused, bias_fused)
    jax.block_until_ready((b_emb, a_emb))

    # Cross-check against plain JAX reference (concat form).
    a_ref = jnp.concatenate((a_hour, a_minute, a_second), -1) @ wa + ba
    b_ref = jnp.concatenate((b_hour, b_minute, b_second), -1) @ wb + bb
    assert jnp.allclose(a_emb, a_ref, atol=1e-4), "a_embedding mismatch"
    assert jnp.allclose(b_emb, b_ref, atol=1e-4), "b_embedding mismatch"
    assert a_emb.shape == (batch, embedding_dim)
    assert b_emb.shape == (batch, embedding_dim)

    print("KERNEL_OK")
</pallas_src>

<mosaic_0001>
module attributes {stable_mosaic.version = 11 : i64} {
  func.func @_module3_kernel(%arg0: memref<8x32xf32, #tpu.memory_space<vmem>>, %arg1: memref<8x32xf32, #tpu.memory_space<vmem>>, %arg2: memref<8x32xf32, #tpu.memory_space<vmem>>, %arg3: memref<8x32xf32, #tpu.memory_space<vmem>>, %arg4: memref<8x32xf32, #tpu.memory_space<vmem>>, %arg5: memref<8x32xf32, #tpu.memory_space<vmem>>, %arg6: memref<192x64xf32, #tpu.memory_space<vmem>>, %arg7: memref<1x64xf32, #tpu.memory_space<vmem>>, %arg8: memref<8x32xf32, #tpu.memory_space<vmem>>, %arg9: memref<8x32xf32, #tpu.memory_space<vmem>>) attributes {dimension_semantics = [], scalar_prefetch = 0 : i64, scratch_operands = 0 : i64, tpu.core_type = #tpu.core_type<tc>} {
    %c0 = arith.constant 0 : index
    %c0_0 = arith.constant 0 : index
    %0 = vector.load %arg0[%c0, %c0_0] : memref<8x32xf32, #tpu.memory_space<vmem>>, vector<8x32xf32>
    %c0_1 = arith.constant 0 : index
    %c0_2 = arith.constant 0 : index
    %1 = vector.load %arg1[%c0_1, %c0_2] : memref<8x32xf32, #tpu.memory_space<vmem>>, vector<8x32xf32>
    %c0_3 = arith.constant 0 : index
    %c0_4 = arith.constant 0 : index
    %2 = vector.load %arg2[%c0_3, %c0_4] : memref<8x32xf32, #tpu.memory_space<vmem>>, vector<8x32xf32>
    %c0_5 = arith.constant 0 : index
    %c0_6 = arith.constant 0 : index
    %3 = vector.load %arg3[%c0_5, %c0_6] : memref<8x32xf32, #tpu.memory_space<vmem>>, vector<8x32xf32>
    %c0_7 = arith.constant 0 : index
    %c0_8 = arith.constant 0 : index
    %4 = vector.load %arg4[%c0_7, %c0_8] : memref<8x32xf32, #tpu.memory_space<vmem>>, vector<8x32xf32>
    %c0_9 = arith.constant 0 : index
    %c0_10 = arith.constant 0 : index
    %5 = vector.load %arg5[%c0_9, %c0_10] : memref<8x32xf32, #tpu.memory_space<vmem>>, vector<8x32xf32>
    %6 = tpu.concatenate %0, %1, %2, %3, %4, %5 in 1 : vector<8x32xf32>, vector<8x32xf32>, vector<8x32xf32>, vector<8x32xf32>, vector<8x32xf32>, vector<8x32xf32> -> vector<8x192xf32>
    %c0_11 = arith.constant 0 : index
    %c0_12 = arith.constant 0 : index
    %7 = vector.load %arg6[%c0_11, %c0_12] : memref<192x64xf32, #tpu.memory_space<vmem>>, vector<192x64xf32>
    %cst = arith.constant dense<0.000000e+00> : vector<8x64xf32>
    %8 = tpu.matmul %6, %7, %cst {dimension_numbers = #tpu.dot_dimension_numbers<[1], [0], [0], [1], [0, 0, 1, 1], [], []>} : vector<8x192xf32>, vector<192x64xf32>, vector<8x64xf32> -> vector<8x64xf32>
    %c0_13 = arith.constant 0 : index
    %c0_14 = arith.constant 0 : index
    %9 = vector.load %arg7[%c0_13, %c0_14] : memref<1x64xf32, #tpu.memory_space<vmem>>, vector<1x64xf32>
    %10 = vector.broadcast %9 : vector<1x64xf32> to vector<8x64xf32>
    %11 = arith.addf %8, %10 : vector<8x64xf32>
    %12 = vector.extract_strided_slice %11 {offsets = [0, 0], sizes = [8, 32], strides = [1, 1]} : vector<8x64xf32> to vector<8x32xf32>
    %c0_15 = arith.constant 0 : index
    %c0_16 = arith.constant 0 : index
    %13 = vector.load %arg8[%c0_15, %c0_16] : memref<8x32xf32, #tpu.memory_space<vmem>>, vector<8x32xf32>
    tpu.vector_store %arg8[%c0_15, %c0_16], %12 {strides = array<i32>} : memref<8x32xf32, #tpu.memory_space<vmem>>, vector<8x32xf32>,
    %14 = vector.extract_strided_slice %11 {offsets = [0, 32], sizes = [8, 32], strides = [1, 1]} : vector<8x64xf32> to vector<8x32xf32>
    %c0_17 = arith.constant 0 : index
    %c0_18 = arith.constant 0 : index
    %15 = vector.load %arg9[%c0_17, %c0_18] : memref<8x32xf32, #tpu.memory_space<vmem>>, vector<8x32xf32>
    tpu.vector_store %arg9[%c0_17, %c0_18], %14 {strides = array<i32>} : memref<8x32xf32, #tpu.memory_space<vmem>>, vector<8x32xf32>,
    return
  }
}

</mosaic_0001>

<bundles_post_ra>
// kernel: tpu_custom_call.1
= control target key start
LH: loop header
LB: loop body
LE: loop exit
PB: predicated region body
PF: predicated region fallthrough
CT: control target
= control target key end

     0   :  { %15 = vsyncpa [#allocation3], 0  ;;  %s292_s13 = smov 32   ;;  %v293_v5 = vmov 0.0|0.0   ;;  %s295_s24 = smov 96   ;;  %s483_s0 = inlined_call_operand.vmem [shape: f32[8,32], index: 0, kind: input, shape index: {}]   ;;  %s484_s1 = inlined_call_operand.vmem [shape: f32[8,32], index: 1, kind: input, shape index: {}]   ;;  %s485_s2 = inlined_call_operand.vmem [shape: f32[8,32], index: 2, kind: input, shape index: {}]   ;;  %s486_s3 = inlined_call_operand.vmem [shape: f32[8,32], index: 3, kind: input, shape index: {}]   ;;  %s487_s4 = inlined_call_operand.vmem [shape: f32[8,32], index: 4, kind: input, shape index: {}]   ;;  %s488_s5 = inlined_call_operand.vmem [shape: f32[8,32], index: 5, kind: input, shape index: {}]   ;;  %s489_s6 = inlined_call_operand.vmem [shape: f32[192,64], index: 6, kind: input, shape index: {}]   ;;  %s490_s7 = inlined_call_operand.vmem [shape: f32[1,64], index: 7, kind: input, shape index: {}]   ;;  %s491_s8 = inlined_call_operand.hbm [shape: f32[8,32], index: 8, kind: output, shape index: {0}]   ;;  %s492_s9 = inlined_call_operand.hbm [shape: f32[8,32], index: 9, kind: output, shape index: {1}]  }
   0x1   :  { %v34_v0 = vld [vmem:[%s484_s1] sm:$0xff]  ;;  %202 = vmatprep.subr.bf16.mxu0 %v293_v5  ;;  %v63_v6 = vld [vmem:[%s489_s6 + $0x8] sm:$0xff]  ;;  %v64_v8 = vld [vmem:[%s489_s6 + $0x10] sm:$0xff] }
   0x2   :  { %v38_v1 = vld [vmem:[%s488_s5] sm:$0xff]  ;;  %40 = vrot.lane.b32.xlu0 %v34_v0, %s292_s13  ;;  %v65_v9 = vld [vmem:[%s489_s6 + $0x18] sm:$0xff]  ;;  %v67_v12 = vld [vmem:[%s489_s6 + $0x28] sm:$0xff] }
   0x3   :  { %52 = vrot.lane.b32.xlu1 %v38_v1, %s292_s13  ;;  %v62_v2 = vld [vmem:[%s489_s6] sm:$0xff]  ;;  %v206_v10 = vpack.c.bf16 %v65_v9, %v64_v8  ;;  %v68_v14 = vld [vmem:[%s489_s6 + $0x30] sm:$0xff]  ;;  %v69_v15 = vld [vmem:[%s489_s6 + $0x38] sm:$0xff] }
   0x4   :  { %v35_v3 = vld [vmem:[%s485_s2] sm:$0xff]  ;;  %v203_v7 = vpack.c.bf16 %v63_v6, %v62_v2  ;;  %s294_s2 = smov 64  }
   0x5   :  { %v36_v4 = vld [vmem:[%s486_s3] sm:$0xff] }
   0x6   :  { %44 = vrot.lane.b32.xlu0 %v35_v3, %s294_s2  ;;  %204 = vmatpush1.bf16.msra.mxu0 %v203_v7  ;;  %v66_v11 = vld [vmem:[%s489_s6 + $0x20] sm:$0xff] }
   0x7   :  { %48 = vrot.lane.b32.xlu1 %v36_v4, %s295_s24  ;;  %205 = vmatprep.subr.bf16.mxu0 %v293_v5  ;;  %v209_v13 = vpack.c.bf16 %v67_v12, %v66_v11 }
   0xa   :  { %207 = vmatpush1.bf16.msra.mxu0 %v206_v10 }
   0xb   :  { %208 = vmatprep.subr.bf16.mxu0 %v293_v5 }
   0xc   :  { %16 = vsyncpa [#allocation5], 0  ;;  %v212_v16 = vpack.c.bf16 %v69_v15, %v68_v14  ;;  %v70_v17 = vld [vmem:[%s489_s6 + $0x40] sm:$0xff]  ;;  %v71_v18 = vld [vmem:[%s489_s6 + $0x48] sm:$0xff]  ;;  %vm55_vm0 = vcmask 261120   ;;  %vm57_vm1 = vcmask 523264  }
   0xd   :  { %v215_v19 = vpack.c.bf16 %v71_v18, %v70_v17  ;;  %v72_v20 = vld [vmem:[%s489_s6 + $0x50] sm:$0xff]  ;;  %v73_v21 = vld [vmem:[%s489_s6 + $0x58] sm:$0xff]  ;;  %v74_v23 = vld [vmem:[%s489_s6 + $0x60] sm:$0xff]  ;;  %vm59_vm2 = vcmask 785408   ;;  %s296_s21 = smov [#allocation2]  }
   0xe   :  { %210 = vmatpush1.bf16.msra.mxu0 %v209_v13  ;;  %v218_v22 = vpack.c.bf16 %v73_v21, %v72_v20  ;;  %v75_v24 = vld [vmem:[%s489_s6 + $0x68] sm:$0xff]  ;;  %v76_v26 = vld [vmem:[%s489_s6 + $0x70] sm:$0xff]  ;;  %v77_v27 = vld [vmem:[%s489_s6 + $0x78] sm:$0xff]  ;;  %s178_s22 = sshll.u32 %s296_s21, 4  ;;  %s179_s22 = int_to_ptr.vmem [resolvable:$true] %s178_s22 }
   0xf   :  { %211 = vmatprep.subr.bf16.mxu0 %v293_v5  ;;  %v221_v25 = vpack.c.bf16 %v75_v24, %v74_v23  ;;  %v224_v28 = vpack.c.bf16 %v77_v27, %v76_v26  ;;  %v78_v29 = vld [vmem:[%s489_s6 + $0x80] sm:$0xff]  ;;  %v79_v30 = vld [vmem:[%s489_s6 + $0x88] sm:$0xff]  ;;  %v80_v32 = vld [vmem:[%s489_s6 + $0x90] sm:$0xff]  ;;  %p249_p1 = scmp.lt.s32.totalorder %s179_s22, %s179_s22 }
  0x10   :  { %v227_v31 = vpack.c.bf16 %v79_v30, %v78_v29  ;;  %v81_v33 = vld [vmem:[%s489_s6 + $0x98] sm:$0xff]  ;;  %v82_v35 = vld [vmem:[%s489_s6 + $0xa0] sm:$0xff]  ;;  %v83_v36 = vld [vmem:[%s489_s6 + $0xa8] sm:$0xff] }
  0x11   :  { %v230_v34 = vpack.c.bf16 %v81_v33, %v80_v32  ;;  %v233_v37 = vpack.c.bf16 %v83_v36, %v82_v35  ;;  %v84_v38 = vld [vmem:[%s489_s6 + $0xb0] sm:$0xff]  ;;  %v85_v39 = vld [vmem:[%s489_s6 + $0xb8] sm:$0xff]  ;;  %v37_v41 = vld [vmem:[%s487_s4] sm:$0xff] }
  0x12   :  { %213 = vmatpush1.bf16.msra.mxu0 %v212_v16  ;;  %v236_v40 = vpack.c.bf16 %v85_v39, %v84_v38  ;;  %v33_v44 = vld [vmem:[%s483_s0] sm:$0xff]  ;;  %s244_s0 = scalar_lea.vmem %s179_s22, 128 }
  0x13   :  { %214 = vmatprep.subr.bf16.mxu0 %v293_v5  ;;  %v200_v51 = vld [vmem:[%s490_s7] ss:$0 sm:$0xff]  ;;  %p245_p0 = scmp.ne.s32.totalorder %s179_s22, %s244_s0  ;;  %p250_p2 = scmp.lt.s32.totalorder %s244_s0, %s244_s0 }
  0x15   :  { %p251_p3 = por %p250_p2, %p249_p1 }
  0x16   :  { %216 = vmatpush1.bf16.msra.mxu0 %v215_v19 }
  0x17   :  { %217 = vmatprep.subr.bf16.mxu0 %v293_v5  ;;  %p252_p4 = pnand %p251_p3, %p245_p0 }
  0x1a   :  { %219 = vmatpush1.bf16.msra.mxu0 %v218_v22 }
  0x1b   :  { %220 = vmatprep.subr.bf16.mxu0 %v293_v5 }
  0x1e   :  { %222 = vmatpush1.bf16.msra.mxu0 %v221_v25 }
  0x1f   :  { %223 = vmatprep.subr.bf16.mxu0 %v293_v5 }
  0x22   :  { %225 = vmatpush1.bf16.msra.mxu0 %v224_v28 }
  0x23   :  { %226 = vmatprep.subr.bf16.mxu0 %v293_v5 }
  0x26   :  { %228 = vmatpush1.bf16.msra.mxu0 %v227_v31 }
  0x27   :  { %229 = vmatprep.subr.bf16.mxu0 %v293_v5 }
  0x2a   :  { %231 = vmatpush1.bf16.msra.mxu0 %v230_v34 }
  0x2b   :  { %232 = vmatprep.subr.bf16.mxu0 %v293_v5 }
  0x2e   :  { %234 = vmatpush1.bf16.msra.mxu0 %v233_v37 }
  0x2f   :  { %235 = vmatprep.subr.bf16.mxu0 %v293_v5 }
  0x32   :  { %237 = vmatpush1.bf16.msra.mxu0 %v236_v40 }
  0x74   :  { %v41_v42 = vpop.permute.xlu0 %40 }
  0x75   :  { %v53_v43 = vpop.permute.xlu1 %52  ;;  %v56_v46 = vsel %vm55_vm0, %v33_v44, %v41_v42 }
  0x76   :  { %v61_v45 = vsel %vm55_vm0, %v37_v41, %v53_v43 }
  0x77   :  { %201 = vmatprep.mubr.msk.f32.mxu0 %vm57_vm1, %v61_v45 }
  0x78   :  { %v45_v47 = vpop.permute.xlu0 %44 }
  0x79   :  { %v49_v48 = vpop.permute.xlu1 %48  ;;  %v58_v49 = vsel %vm57_vm1, %v56_v46, %v45_v47 }
  0x7a   :  { %v60_v50 = vsel %vm59_vm2, %v58_v49, %v49_v48 }
  0x7b   :  { %161 = vmatmul.mubr.f32.vlgmr.msra.gmra.mrb[0].mxu0 %v60_v50 }
 0x14e   :  { %v162_v52 = vpop.f32.mrb[0].mxu0 }
 0x14f   :  { %v163_v53 = vadd.f32 %v200_v51, %v162_v52  ;;  %v164_v54 = vpop.f32.mrb[1].mxu0 }
 0x151   :  { %166 = vst.msk [vmem:[#allocation2] sm:$0xff] %vm55_vm0, %v163_v53  ;;  %168 = vrot.lane.b32.xlu0 %v163_v53, %s295_s24 }
 0x152   :  { %255 = shalt.err (!%p252_p4)
}
 0x153   :  { %s256_s7 = scalar_lea.hbm %s491_s8, 128 }
 0x154   :  { %p257_p5 = scmp.ne.s32.totalorder %s491_s8, %s256_s7  ;;  %p260_p6 = scmp.lt.u32.totalorder %s256_s7, %s491_s8 }
 0x156   :  { %p262_p7 = pnand %p260_p6, %p257_p5 }
 0x158   :  { %265 = shalt.err (!%p262_p7)
}
 0x159   :  { %181 = dma.vmem_to_hbm [thread:$0]  %s179_s22, 128, %s491_s8, [#allocation3]  }
 0x15a   :  { %s297_s29 = smov [#allocation4]  }
 0x15b   :  { %s188_s30 = sshll.u32 %s297_s29, 4  ;;  %s189_s30 = int_to_ptr.vmem [resolvable:$true] %s188_s30 }
 0x15c   :  { %s266_s10 = scalar_lea.vmem %s189_s30, 128  ;;  %p271_p9 = scmp.lt.s32.totalorder %s189_s30, %s189_s30 }
 0x15d   :  { %p267_p8 = scmp.ne.s32.totalorder %s189_s30, %s266_s10  ;;  %p272_p10 = scmp.lt.s32.totalorder %s266_s10, %s266_s10 }
 0x15f   :  { %p273_p11 = por %p272_p10, %p271_p9 }
 0x161   :  { %p274_p12 = pnand %p273_p11, %p267_p8 }
 0x1c3   :  { %v169_v55 = vpop.permute.xlu0 %168 }
 0x1c4   :  { %171 = vst.msk [vmem:[#allocation4] sm:$0xff] %vm55_vm0, %v169_v55 }
 0x1c5   :  { %277 = shalt.err (!%p274_p12)
}
 0x1c6   :  { %s278_s13 = scalar_lea.hbm %s492_s9, 128 }
 0x1c7   :  { %p279_p13 = scmp.ne.s32.totalorder %s492_s9, %s278_s13  ;;  %p282_p0 = scmp.lt.u32.totalorder %s278_s13, %s492_s9 }
 0x1c9   :  { %p284_p1 = pnand %p282_p0, %p279_p13 }
 0x1cb   :  { %287 = shalt.err (!%p284_p1)
}
 0x1cc   :  { %191 = dma.vmem_to_hbm [thread:$0]  %s189_s30, 128, %s492_s9, [#allocation5]  }
 0x1cd   :  { %288 = dma.done.wait [#allocation3], 128  }
 0x1ce   :  { %289 = vsyncadd [#allocation3], 4294967168 }
 0x1cf   :  { %290 = dma.done.wait [#allocation5], 128  }
 0x1d0   :  { %291 = vsyncadd [#allocation5], 4294967168 }
 0x1d1   :  { %198 = vsyncpa [#allocation3], 1 }
 0x1d2   :  { %199 = vsyncpa [#allocation5], 1 }

</bundles_post_ra>
